<compile_context>
chip_gen: v5e
topology: v5e:2x2
jax: 0.10.0
libtpu: 0.0.40
codegen_flags: <defaults>
</compile_context>

<pallas_src>
import functools

import jax
import jax.numpy as jnp
from jax import lax
from jax.experimental import pallas as pl
from jax.experimental.pallas import tpu as pltpu

_LANE = 128


def _qnet_kernel(x_ref, w1_ref, b1_ref, w2_ref, b2_ref, o_ref):
    # hidden = relu(x @ W1^T + b1); W1 kept in (out, in) layout, the transposed
    # RHS is consumed directly by the MXU via dot_general contracting dims.
    h = lax.dot_general(
        x_ref[...], w1_ref[...],
        dimension_numbers=(((1,), (1,)), ((), ())),
        preferred_element_type=jnp.float32)
    h = jnp.maximum(h + b1_ref[...], 0.0)
    # out = hidden @ W2p^T + b2p   (W2p / b2p are zero-padded to 128 out lanes)
    o = lax.dot_general(
        h, w2_ref[...],
        dimension_numbers=(((1,), (1,)), ((), ())),
        preferred_element_type=jnp.float32) + b2_ref[...]
    o_ref[...] = o.astype(o_ref.dtype)


def prepare_params(w1, b1, w2, b2):
    """One-time parameter prep (call once, OUTSIDE the training/step loop).

    Keeps PyTorch nn.Linear (out, in) layout (no transposes), makes biases 2-D
    for VPU broadcast, and zero-pads the output features up to a lane-dense
    multiple of 128 so the kernel store is unmasked.
    Returns (w1, b1r, w2p, b2p, out_features).
    """
    w1 = jnp.asarray(w1, jnp.float32)            # (H, I)
    b1 = jnp.asarray(b1, jnp.float32)            # (H,)
    w2 = jnp.asarray(w2, jnp.float32)            # (O, H)
    b2 = jnp.asarray(b2, jnp.float32)            # (O,)
    O, H = w2.shape
    o_pad = max(_LANE, ((O + _LANE - 1) // _LANE) * _LANE)
    w2p = jnp.zeros((o_pad, H), jnp.float32).at[:O, :].set(w2)
    b2p = jnp.zeros((1, o_pad), jnp.float32).at[0, :O].set(b2)
    return w1, b1.reshape(1, H), w2p, b2p, O


@functools.partial(jax.jit, static_argnames=("out_features", "block_b"))
def linear_qnet_forward(x, w1, b1r, w2p, b2p, *, out_features, block_b=128):
    """relu(x @ W1^T + b1) @ W2^T + b2 -> (B, out_features) float32."""
    x = jnp.asarray(x, jnp.float32)
    B, I = x.shape
    H = w1.shape[0]
    o_pad = w2p.shape[0]

    # Batch tile: a multiple of 8 sublanes (128 rows) or the whole batch if
    # smaller; weights are tiny and stay VMEM-resident across grid steps.
    tb = block_b if B >= block_b else B
    grid = (pl.cdiv(B, tb),)

    out = pl.pallas_call(
        _qnet_kernel,
        out_shape=jax.ShapeDtypeStruct((B, o_pad), jnp.float32),
        grid_spec=pltpu.PrefetchScalarGridSpec(
            num_scalar_prefetch=0,
            grid=grid,
            in_specs=[
                pl.BlockSpec((tb, I), lambda i: (i, 0)),       # x batch tile
                pl.BlockSpec((H, I), lambda i: (0, 0)),        # W1 (out,in), resident
                pl.BlockSpec((1, H), lambda i: (0, 0)),        # b1
                pl.BlockSpec((o_pad, H), lambda i: (0, 0)),    # W2 padded (out,in)
                pl.BlockSpec((1, o_pad), lambda i: (0, 0)),    # b2 padded
            ],
            out_specs=pl.BlockSpec((tb, o_pad), lambda i: (i, 0)),
        ),
        compiler_params=pltpu.CompilerParams(
            dimension_semantics=("parallel",)),  # v7x: 2 TCs split the batch grid
    )(x, w1, b1r, w2p, b2p)
    # Slice padded lanes back to the real number of Q-values.
    return out[:, :out_features]


def _init_linear(key, out_features, in_features):
    # Deterministic init mimicking PyTorch nn.Linear default:
    # U(-1/sqrt(fan_in), 1/sqrt(fan_in)) for both weight and bias.
    kw, kb = jax.random.split(key)
    bound = 1.0 / jnp.sqrt(jnp.float32(in_features))
    w = jax.random.uniform(kw, (out_features, in_features), jnp.float32,
                           minval=-bound, maxval=bound)
    b = jax.random.uniform(kb, (out_features,), jnp.float32,
                           minval=-bound, maxval=bound)
    return w, b


# TODO(synk): Linear_QNet.save (torch.save checkpointing) is host-side I/O,
# not a kernel op; intentionally not implemented.

if __name__ == "__main__":
    # Snake DQN sizes: inputsize=11, hiddensize=32, outputsize=3.
    # Batch of 256 states per call (replay-buffer style) to amortize launch/DMA
    # overhead; grid of 2 batch tiles of 128 rows.
    INPUTSIZE, HIDDENSIZE, OUTPUTSIZE = 11, 32, 3
    BATCH = 256

    key = jax.random.PRNGKey(0)
    kx, k1, k2 = jax.random.split(key, 3)

    x = jax.random.normal(kx, (BATCH, INPUTSIZE), jnp.float32)
    w1, b1 = _init_linear(k1, HIDDENSIZE, INPUTSIZE)
    w2, b2 = _init_linear(k2, OUTPUTSIZE, HIDDENSIZE)

    # One-time parameter prep (layout + lane padding), outside the step loop.
    w1p, b1r, w2p, b2p, O = prepare_params(w1, b1, w2, b2)

    out = linear_qnet_forward(x, w1p, b1r, w2p, b2p, out_features=O)
    out = jax.block_until_ready(out)

    # Pure-JAX reference check against the original PyTorch semantics.
    ref = jnp.maximum(x @ w1.T + b1, 0.0) @ w2.T + b2
    assert out.shape == (BATCH, OUTPUTSIZE)
    assert jnp.allclose(out, ref, atol=1e-5, rtol=1e-5)

    print("KERNEL_OK")
</pallas_src>

<mosaic_0001>
module attributes {stable_mosaic.version = 11 : i64} {
  func.func @_qnet_kernel(%arg0: i32, %arg1: memref<128x11xf32, #tpu.memory_space<vmem>>, %arg2: memref<32x11xf32, #tpu.memory_space<vmem>>, %arg3: memref<1x32xf32, #tpu.memory_space<vmem>>, %arg4: memref<128x32xf32, #tpu.memory_space<vmem>>, %arg5: memref<1x128xf32, #tpu.memory_space<vmem>>, %arg6: memref<128x128xf32, #tpu.memory_space<vmem>>) attributes {dimension_semantics = [#tpu.dimension_semantics<parallel>], iteration_bounds = array<i64: 2>, scalar_prefetch = 0 : i64, scratch_operands = 0 : i64, tpu.core_type = #tpu.core_type<tc>, window_params = [{transform_indices = @transform_0, window_bounds = array<i64: 128, 11>}, {pipeline_mode = #tpu.pipeline_mode<synchronous>, transform_indices = @transform_1, window_bounds = array<i64: 32, 11>}, {pipeline_mode = #tpu.pipeline_mode<synchronous>, transform_indices = @transform_2, window_bounds = array<i64: 1, 32>}, {pipeline_mode = #tpu.pipeline_mode<synchronous>, transform_indices = @transform_3, window_bounds = array<i64: 128, 32>}, {pipeline_mode = #tpu.pipeline_mode<synchronous>, transform_indices = @transform_4, window_bounds = array<i64: 1, 128>}, {transform_indices = @transform_5, window_bounds = array<i64: 128, 128>}]} {
    %c0 = arith.constant 0 : index
    %c0_0 = arith.constant 0 : index
    %0 = vector.load %arg1[%c0, %c0_0] : memref<128x11xf32, #tpu.memory_space<vmem>>, vector<128x11xf32>
    %c0_1 = arith.constant 0 : index
    %c0_2 = arith.constant 0 : index
    %1 = vector.load %arg2[%c0_1, %c0_2] : memref<32x11xf32, #tpu.memory_space<vmem>>, vector<32x11xf32>
    %cst = arith.constant dense<0.000000e+00> : vector<128x32xf32>
    %2 = tpu.matmul %0, %1, %cst {dimension_numbers = #tpu.dot_dimension_numbers<[1], [1], [0], [0], [0, 0, 1, 0], [], []>} : vector<128x11xf32>, vector<32x11xf32>, vector<128x32xf32> -> vector<128x32xf32>
    %c0_3 = arith.constant 0 : index
    %c0_4 = arith.constant 0 : index
    %3 = vector.load %arg3[%c0_3, %c0_4] : memref<1x32xf32, #tpu.memory_space<vmem>>, vector<1x32xf32>
    %4 = vector.broadcast %3 : vector<1x32xf32> to vector<128x32xf32>
    %5 = arith.addf %2, %4 : vector<128x32xf32>
    %cst_5 = arith.constant 0.000000e+00 : f32
    %6 = vector.broadcast %cst_5 : f32 to vector<128x32xf32>
    %7 = arith.maximumf %5, %6 : vector<128x32xf32>
    %c0_6 = arith.constant 0 : index
    %c0_7 = arith.constant 0 : index
    %8 = vector.load %arg4[%c0_6, %c0_7] : memref<128x32xf32, #tpu.memory_space<vmem>>, vector<128x32xf32>
    %cst_8 = arith.constant dense<0.000000e+00> : vector<128x128xf32>
    %9 = tpu.matmul %7, %8, %cst_8 {dimension_numbers = #tpu.dot_dimension_numbers<[1], [1], [0], [0], [0, 0, 1, 0], [], []>} : vector<128x32xf32>, vector<128x32xf32>, vector<128x128xf32> -> vector<128x128xf32>
    %c0_9 = arith.constant 0 : index
    %c0_10 = arith.constant 0 : index
    %10 = vector.load %arg5[%c0_9, %c0_10] : memref<1x128xf32, #tpu.memory_space<vmem>>, vector<1x128xf32>
    %11 = vector.broadcast %10 : vector<1x128xf32> to vector<128x128xf32>
    %12 = arith.addf %9, %11 : vector<128x128xf32>
    %c0_11 = arith.constant 0 : index
    %c0_12 = arith.constant 0 : index
    %13 = vector.load %arg6[%c0_11, %c0_12] : memref<128x128xf32, #tpu.memory_space<vmem>>, vector<128x128xf32>
    tpu.vector_store %arg6[%c0_11, %c0_12], %12 {strides = array<i32>} : memref<128x128xf32, #tpu.memory_space<vmem>>, vector<128x128xf32>,
    return
  }
  func.func @transform_0(%arg0: i32) -> (i32, i32) {
    %c0_i32 = arith.constant 0 : i32
    %c0_i32_0 = arith.constant 0 : i32
    return %arg0, %c0_i32 : i32, i32
  }
  func.func @transform_1(%arg0: i32) -> (i32, i32) {
    %c0_i32 = arith.constant 0 : i32
    %c0_i32_0 = arith.constant 0 : i32
    %c0_i32_1 = arith.constant 0 : i32
    return %c0_i32, %c0_i32_0 : i32, i32
  }
  func.func @transform_2(%arg0: i32) -> (i32, i32) {
    %c0_i32 = arith.constant 0 : i32
    %c0_i32_0 = arith.constant 0 : i32
    %c0_i32_1 = arith.constant 0 : i32
    return %c0_i32, %c0_i32_0 : i32, i32
  }
  func.func @transform_3(%arg0: i32) -> (i32, i32) {
    %c0_i32 = arith.constant 0 : i32
    %c0_i32_0 = arith.constant 0 : i32
    %c0_i32_1 = arith.constant 0 : i32
    return %c0_i32, %c0_i32_0 : i32, i32
  }
  func.func @transform_4(%arg0: i32) -> (i32, i32) {
    %c0_i32 = arith.constant 0 : i32
    %c0_i32_0 = arith.constant 0 : i32
    %c0_i32_1 = arith.constant 0 : i32
    return %c0_i32, %c0_i32_0 : i32, i32
  }
  func.func @transform_5(%arg0: i32) -> (i32, i32) {
    %c0_i32 = arith.constant 0 : i32
    %c0_i32_0 = arith.constant 0 : i32
    return %arg0, %c0_i32 : i32, i32
  }
}

</mosaic_0001>

<bundles_post_ra>
// kernel: linear_qnet_forward.1
= control target key start
LH: loop header
LB: loop body
LE: loop exit
PB: predicated region body
PF: predicated region fallthrough
CT: control target
= control target key end

     0   :  { %s791_s18 = smov 0   ;;  %s1001_s0 = inlined_call_operand.vmem [shape: f32[256,11], index: 0, kind: input, shape index: {}]   ;;  %s1002_s1 = inlined_call_operand.vmem [shape: f32[32,11], index: 1, kind: input, shape index: {}]   ;;  %s1003_s2 = inlined_call_operand.vmem [shape: f32[1,32], index: 2, kind: input, shape index: {}]   ;;  %s1004_s3 = inlined_call_operand.vmem [shape: f32[128,32], index: 3, kind: input, shape index: {}]   ;;  %s1005_s4 = inlined_call_operand.vmem [shape: f32[1,128], index: 4, kind: input, shape index: {}]   ;;  %s1006_s5 = inlined_call_operand.vmem [shape: f32[256,128], index: 5, kind: output, shape index: {}]  }
   0x1 LB: > { %s648_s19 = sadd.s32 4294967295, %s759_s18   ;;  %p652_p0 = scmp.ge.s32.totalorder %s759_s18, 1  ;;  %s759_s18 = sphi %s791_s18, %s15_s18  }
   0x2   : > { %p188_p1 = scmp.lt.s32.totalorder %s759_s18, 3 }
   0x4   : > { %p189_p2 = pnand %p652_p0, %p188_p1 }
   0x5   : > { %s653_s22 = sshll.u32 (!%p189_p2), %s648_s19, 4 }
   0x6   : > { %192 = sbr.rel (%p189_p2) target bundleno = 412 (0x19c), region = 40  ;;  %p217_p3 = scmp.lt.s32.totalorder (!%p189_p2), %s653_s22, 31 }
   0xb   : > { %v247_v0 = vld [vmem:[%s1002_s1 + $0x18] sm:$0xff]  ;;  %vm252_vm0 = vcmask 89088   ;;  %v246_v1 = vld [vmem:[%s1002_s1 + $0x10] sm:$0xff]  ;;  %s1008_s22 = smov (!%p217_p3, %s653_s22), 31  ;;  %v245_v2 = vld [vmem:[%s1002_s1 + $0x8] sm:$0xff]  ;;  %vm414_vm1 = vcmask 261120  }
   0xc   : > { %657 = vmatpush.xpose.msk.msra.mxu0 %vm252_vm0, %v247_v0  ;;  %s654_s27 = sshll.u32 %s1008_s22, 3  ;;  %v244_v3 = vld [vmem:[%s1002_s1] sm:$0xff]  ;;  %v409_v9 = vld [vmem:[%s1004_s3 + $0x78] sm:$0xff]  ;;  %v408_v10 = vld [vmem:[%s1004_s3 + $0x70] sm:$0xff] }
   0xd   : > { %s822_s7 = scalar_lea.vmem %s1001_s0, %s654_s27  ;;  %677 = vmatpush.xpose.msk.msra.mxu1 %vm414_vm1, %v409_v9  ;;  %711 = vmatpush.xpose.msk.msra.mxu2 %vm414_vm1, %v409_v9  ;;  %v407_v12 = vld [vmem:[%s1004_s3 + $0x68] sm:$0xff]  ;;  %v406_v13 = vld [vmem:[%s1004_s3 + $0x60] sm:$0xff]  ;;  %v405_v15 = vld [vmem:[%s1004_s3 + $0x58] sm:$0xff]  ;;  %s980_s26 = scalar_lea.vmem %s1006_s5, %s654_s27 }
   0xe   : > { %v228_v4 = vld [vmem:[%s822_s7] sm:$0xff]  ;;  %v229_v5 = vld [vmem:[%s822_s7 + $0x8] sm:$0xff]  ;;  %v230_v6 = vld [vmem:[%s822_s7 + $0x10] sm:$0xff]  ;;  %712 = vmatpush.xpose.msk.msra.mxu3 %vm414_vm1, %v409_v9 }
   0xf   : > { %v231_v7 = vld [vmem:[%s822_s7 + $0x18] sm:$0xff]  ;;  %v232_v8 = vld [vmem:[%s822_s7 + $0x20] sm:$0xff]  ;;  %v233_v11 = vld [vmem:[%s822_s7 + $0x28] sm:$0xff] }
  0x10   : > { %658 = vmatpush.xpose.msk.msra.mxu0 %vm252_vm0, %v246_v1  ;;  %v234_v14 = vld [vmem:[%s822_s7 + $0x30] sm:$0xff]  ;;  %v235_v17 = vld [vmem:[%s822_s7 + $0x38] sm:$0xff]  ;;  %v403_v18 = vld [vmem:[%s1004_s3 + $0x48] sm:$0xff] }
  0x11   : > { %678 = vmatpush.xpose.msk.msra.mxu1 %vm414_vm1, %v408_v10  ;;  %713 = vmatpush.xpose.msk.msra.mxu2 %vm414_vm1, %v408_v10  ;;  %v404_v16 = vld [vmem:[%s1004_s3 + $0x50] sm:$0xff]  ;;  %v402_v19 = vld [vmem:[%s1004_s3 + $0x40] sm:$0xff]  ;;  %v401_v21 = vld [vmem:[%s1004_s3 + $0x38] sm:$0xff] }
  0x12   : > { %714 = vmatpush.xpose.msk.msra.mxu3 %vm414_vm1, %v408_v10  ;;  %v236_v20 = vld [vmem:[%s822_s7 + $0x40] sm:$0xff]  ;;  %v400_v22 = vld [vmem:[%s1004_s3 + $0x30] sm:$0xff]  ;;  %v237_v23 = vld [vmem:[%s822_s7 + $0x48] sm:$0xff] }
  0x13   : > { %v399_v24 = vld [vmem:[%s1004_s3 + $0x28] sm:$0xff]  ;;  %v398_v25 = vld [vmem:[%s1004_s3 + $0x20] sm:$0xff]  ;;  %v238_v26 = vld [vmem:[%s822_s7 + $0x50] sm:$0xff] }
  0x14   : > { %659 = vmatpush.xpose.msk.msra.mxu0 %vm252_vm0, %v245_v2  ;;  %v397_v27 = vld [vmem:[%s1004_s3 + $0x18] sm:$0xff]  ;;  %v396_v28 = vld [vmem:[%s1004_s3 + $0x10] sm:$0xff]  ;;  %v395_v30 = vld [vmem:[%s1004_s3 + $0x8] sm:$0xff] }
  0x15   : > { %679 = vmatpush.xpose.msk.msra.mxu1 %vm414_vm1, %v407_v12  ;;  %715 = vmatpush.xpose.msk.msra.mxu2 %vm414_vm1, %v407_v12  ;;  %v239_v29 = vld [vmem:[%s822_s7 + $0x58] sm:$0xff]  ;;  %v240_v31 = vld [vmem:[%s822_s7 + $0x60] sm:$0xff]  ;;  %v241_v33 = vld [vmem:[%s822_s7 + $0x68] sm:$0xff] }
  0x16   : > { %716 = vmatpush.xpose.msk.msra.mxu3 %vm414_vm1, %v407_v12  ;;  %v394_v32 = vld [vmem:[%s1004_s3] sm:$0xff]  ;;  %v242_v34 = vld [vmem:[%s822_s7 + $0x70] sm:$0xff]  ;;  %v243_v35 = vld [vmem:[%s822_s7 + $0x78] sm:$0xff] }
  0x17   : > { %v751_v36 = vld [vmem:[%s1003_s2] ss:$0 sm:$0xff] }
  0x18   : > { %660 = vmatpush.xpose.msk.msra.mxu0 %vm252_vm0, %v244_v3 }
  0x19   : > { %680 = vmatpush.xpose.msk.msra.mxu1 %vm414_vm1, %v406_v13  ;;  %717 = vmatpush.xpose.msk.msra.mxu2 %vm414_vm1, %v406_v13 }
  0x1a   : > { %718 = vmatpush.xpose.msk.msra.mxu3 %vm414_vm1, %v406_v13 }
  0x1b   : > { %661 = vmatmul.msk.f32.vlgmr.msra.gmra.mxu0 %vm252_vm0, %v228_v4 }
  0x1d   : > { %681 = vmatpush.xpose.msk.msra.mxu1 %vm414_vm1, %v405_v15  ;;  %719 = vmatpush.xpose.msk.msra.mxu2 %vm414_vm1, %v405_v15 }
  0x1e   : > { %720 = vmatpush.xpose.msk.msra.mxu3 %vm414_vm1, %v405_v15 }
  0x21   : > { %682 = vmatpush.xpose.msk.msra.mxu1 %vm414_vm1, %v404_v16  ;;  %721 = vmatpush.xpose.msk.msra.mxu2 %vm414_vm1, %v404_v16 }
  0x22   : > { %722 = vmatpush.xpose.msk.msra.mxu3 %vm414_vm1, %v404_v16 }
  0x23   : > { %662 = vmatmul.msk.f32.gmra.mxu0 %vm252_vm0, %v229_v5 }
  0x25   : > { %683 = vmatpush.xpose.msk.msra.mxu1 %vm414_vm1, %v403_v18  ;;  %723 = vmatpush.xpose.msk.msra.mxu2 %vm414_vm1, %v403_v18 }
  0x26   : > { %724 = vmatpush.xpose.msk.msra.mxu3 %vm414_vm1, %v403_v18 }
  0x29   : > { %684 = vmatpush.xpose.msk.msra.mxu1 %vm414_vm1, %v402_v19  ;;  %725 = vmatpush.xpose.msk.msra.mxu2 %vm414_vm1, %v402_v19 }
  0x2a   : > { %726 = vmatpush.xpose.msk.msra.mxu3 %vm414_vm1, %v402_v19 }
  0x2b   : > { %663 = vmatmul.msk.f32.gmra.mxu0 %vm252_vm0, %v230_v6 }
  0x2d   : > { %685 = vmatpush.xpose.msk.msra.mxu1 %vm414_vm1, %v401_v21  ;;  %727 = vmatpush.xpose.msk.msra.mxu2 %vm414_vm1, %v401_v21 }
  0x2e   : > { %728 = vmatpush.xpose.msk.msra.mxu3 %vm414_vm1, %v401_v21  ;;  %v752_v21 = vld [vmem:[%s1005_s4] ss:$0 sm:$0xff] }
  0x31   : > { %686 = vmatpush.xpose.msk.msra.mxu1 %vm414_vm1, %v400_v22  ;;  %729 = vmatpush.xpose.msk.msra.mxu2 %vm414_vm1, %v400_v22 }
  0x32   : > { %730 = vmatpush.xpose.msk.msra.mxu3 %vm414_vm1, %v400_v22 }
  0x33   : > { %664 = vmatmul.msk.f32.gmra.mxu0 %vm252_vm0, %v231_v7 }
  0x35   : > { %687 = vmatpush.xpose.msk.msra.mxu1 %vm414_vm1, %v399_v24  ;;  %731 = vmatpush.xpose.msk.msra.mxu2 %vm414_vm1, %v399_v24 }
  0x36   : > { %732 = vmatpush.xpose.msk.msra.mxu3 %vm414_vm1, %v399_v24 }
  0x39   : > { %688 = vmatpush.xpose.msk.msra.mxu1 %vm414_vm1, %v398_v25  ;;  %733 = vmatpush.xpose.msk.msra.mxu2 %vm414_vm1, %v398_v25 }
  0x3a   : > { %734 = vmatpush.xpose.msk.msra.mxu3 %vm414_vm1, %v398_v25 }
  0x3b   : > { %665 = vmatmul.msk.f32.gmra.mxu0 %vm252_vm0, %v232_v8 }
  0x3d   : > { %689 = vmatpush.xpose.msk.msra.mxu1 %vm414_vm1, %v397_v27  ;;  %735 = vmatpush.xpose.msk.msra.mxu2 %vm414_vm1, %v397_v27 }
  0x3e   : > { %736 = vmatpush.xpose.msk.msra.mxu3 %vm414_vm1, %v397_v27 }
  0x41   : > { %690 = vmatpush.xpose.msk.msra.mxu1 %vm414_vm1, %v396_v28  ;;  %737 = vmatpush.xpose.msk.msra.mxu2 %vm414_vm1, %v396_v28 }
  0x42   : > { %738 = vmatpush.xpose.msk.msra.mxu3 %vm414_vm1, %v396_v28 }
  0x43   : > { %666 = vmatmul.msk.f32.gmra.mxu0 %vm252_vm0, %v233_v11 }
  0x45   : > { %691 = vmatpush.xpose.msk.msra.mxu1 %vm414_vm1, %v395_v30  ;;  %739 = vmatpush.xpose.msk.msra.mxu2 %vm414_vm1, %v395_v30 }
  0x46   : > { %740 = vmatpush.xpose.msk.msra.mxu3 %vm414_vm1, %v395_v30 }
  0x49   : > { %692 = vmatpush.xpose.msk.msra.mxu1 %vm414_vm1, %v394_v32  ;;  %741 = vmatpush.xpose.msk.msra.mxu2 %vm414_vm1, %v394_v32 }
  0x4a   : > { %742 = vmatpush.xpose.msk.msra.mxu3 %vm414_vm1, %v394_v32 }
  0x4b   : > { %667 = vmatmul.msk.f32.gmra.mxu0 %vm252_vm0, %v234_v14 }
  0x53   : > { %668 = vmatmul.msk.f32.gmra.mxu0 %vm252_vm0, %v235_v17 }
  0x5b   : > { %669 = vmatmul.msk.f32.gmra.mxu0 %vm252_vm0, %v236_v20 }
  0x63   : > { %670 = vmatmul.msk.f32.gmra.mxu0 %vm252_vm0, %v237_v23 }
  0x6b   : > { %671 = vmatmul.msk.f32.gmra.mxu0 %vm252_vm0, %v238_v26 }
  0x73   : > { %672 = vmatmul.msk.f32.gmra.mxu0 %vm252_vm0, %v239_v29 }
  0x7b   : > { %673 = vmatmul.msk.f32.gmra.mxu0 %vm252_vm0, %v240_v31 }
  0x83   : > { %674 = vmatmul.msk.f32.gmra.mxu0 %vm252_vm0, %v241_v33 }
  0x8b   : > { %675 = vmatmul.msk.f32.gmra.mxu0 %vm252_vm0, %v242_v34 }
  0x93   : > { %676 = vmatmul.msk.f32.gmra.mxu0 %vm252_vm0, %v243_v35 }
  0x98   : > { %v330_v37 = vpop.f32.mrf.mxu0 }
  0x99   : > { %v331_v38 = vadd.f32 %v751_v36, %v330_v37 }
  0x9b   : > { %v378_v39 = vmax.f32 %v331_v38, 0.0 }
  0x9d   : > { %693 = vmatmul.msk.f32.vlgmr.msra.gmra.mxu1 %vm414_vm1, %v378_v39 }
  0xa0   : > { %v333_v40 = vpop.f32.mrf.mxu0 }
  0xa1   : > { %v334_v41 = vadd.f32 %v751_v36, %v333_v40 }
  0xa3   : > { %v379_v42 = vmax.f32 %v334_v41, 0.0 }
  0xa5   : > { %694 = vmatmul.msk.f32.gmra.mxu1 %vm414_vm1, %v379_v42 }
  0xa8   : > { %v336_v43 = vpop.f32.mrf.mxu0 }
  0xa9   : > { %v337_v44 = vadd.f32 %v751_v36, %v336_v43 }
  0xab   : > { %v380_v45 = vmax.f32 %v337_v44, 0.0 }
  0xad   : > { %695 = vmatmul.msk.f32.gmra.mxu1 %vm414_vm1, %v380_v45 }
  0xb0   : > { %v339_v46 = vpop.f32.mrf.mxu0 }
  0xb1   : > { %v340_v47 = vadd.f32 %v751_v36, %v339_v46 }
  0xb3   : > { %v381_v48 = vmax.f32 %v340_v47, 0.0 }
  0xb5   : > { %696 = vmatmul.msk.f32.gmra.mxu1 %vm414_vm1, %v381_v48 }
  0xb8   : > { %v342_v49 = vpop.f32.mrf.mxu0 }
  0xb9   : > { %v343_v50 = vadd.f32 %v751_v36, %v342_v49 }
  0xbb   : > { %v382_v51 = vmax.f32 %v343_v50, 0.0 }
  0xbd   : > { %697 = vmatmul.msk.f32.gmra.mxu1 %vm414_vm1, %v382_v51 }
  0xc0   : > { %v345_v52 = vpop.f32.mrf.mxu0 }
  0xc1   : > { %v346_v53 = vadd.f32 %v751_v36, %v345_v52 }
  0xc3   : > { %v383_v54 = vmax.f32 %v346_v53, 0.0 }
  0xc5   : > { %698 = vmatmul.msk.f32.vlgmr.msra.gmra.mxu2 %vm414_vm1, %v383_v54 }
  0xc8   : > { %v348_v55 = vpop.f32.mrf.mxu0 }
  0xc9   : > { %v349_v56 = vadd.f32 %v751_v36, %v348_v55 }
  0xcb   : > { %v384_v57 = vmax.f32 %v349_v56, 0.0 }
  0xcd   : > { %699 = vmatmul.msk.f32.gmra.mxu2 %vm414_vm1, %v384_v57 }
  0xd0   : > { %v351_v58 = vpop.f32.mrf.mxu0 }
  0xd1   : > { %v352_v59 = vadd.f32 %v751_v36, %v351_v58 }
  0xd3   : > { %v385_v60 = vmax.f32 %v352_v59, 0.0 }
  0xd5   : > { %700 = vmatmul.msk.f32.gmra.mxu2 %vm414_vm1, %v385_v60 }
  0xd8   : > { %v354_v61 = vpop.f32.mrf.mxu0 }
  0xd9   : > { %v355_v62 = vadd.f32 %v751_v36, %v354_v61 }
  0xdb   : > { %v386_v63 = vmax.f32 %v355_v62, 0.0 }
  0xdd   : > { %701 = vmatmul.msk.f32.gmra.mxu2 %vm414_vm1, %v386_v63 }
  0xe0   : > { %v357_v0 = vpop.f32.mrf.mxu0 }
  0xe1   : > { %v358_v1 = vadd.f32 %v751_v36, %v357_v0 }
  0xe3   : > { %v387_v2 = vmax.f32 %v358_v1, 0.0 }
  0xe5   : > { %702 = vmatmul.msk.f32.gmra.mxu2 %vm414_vm1, %v387_v2 }
  0xe8   : > { %v360_v3 = vpop.f32.mrf.mxu0 }
  0xe9   : > { %v361_v4 = vadd.f32 %v751_v36, %v360_v3 }
  0xeb   : > { %v388_v5 = vmax.f32 %v361_v4, 0.0 }
  0xed   : > { %703 = vmatmul.msk.f32.gmra.mxu2 %vm414_vm1, %v388_v5 }
  0xf0   : > { %v363_v6 = vpop.f32.mrf.mxu0 }
  0xf1   : > { %v364_v7 = vadd.f32 %v751_v36, %v363_v6 }
  0xf3   : > { %v389_v8 = vmax.f32 %v364_v7, 0.0 }
  0xf5   : > { %704 = vmatmul.msk.f32.gmra.mxu2 %vm414_vm1, %v389_v8 }
  0xf8   : > { %v366_v9 = vpop.f32.mrf.mxu0 }
  0xf9   : > { %v367_v10 = vadd.f32 %v751_v36, %v366_v9 }
  0xfb   : > { %v390_v11 = vmax.f32 %v367_v10, 0.0 }
  0xfd   : > { %705 = vmatmul.msk.f32.vlgmr.msra.gmra.mxu3 %vm414_vm1, %v390_v11 }
 0x100   : > { %v369_v12 = vpop.f32.mrf.mxu0 }
 0x101   : > { %v370_v13 = vadd.f32 %v751_v36, %v369_v12 }
 0x103   : > { %v391_v14 = vmax.f32 %v370_v13, 0.0 }
 0x105   : > { %706 = vmatmul.msk.f32.gmra.mxu3 %vm414_vm1, %v391_v14 }
 0x108   : > { %v372_v15 = vpop.f32.mrf.mxu0 }
 0x109   : > { %v373_v16 = vadd.f32 %v751_v36, %v372_v15 }
 0x10b   : > { %v392_v17 = vmax.f32 %v373_v16, 0.0 }
 0x10d   : > { %707 = vmatmul.msk.f32.gmra.mxu3 %vm414_vm1, %v392_v17 }
 0x110   : > { %v375_v18 = vpop.f32.mrf.mxu0 }
 0x111   : > { %v376_v19 = vadd.f32 %v751_v36, %v375_v18 }
 0x113   : > { %v393_v20 = vmax.f32 %v376_v19, 0.0 }
 0x115   : > { %708 = vmatmul.msk.f32.gmra.mxu3 %vm414_vm1, %v393_v20 }
 0x11a   : > { %v528_v22 = vpop.f32.mrf.mxu1 }
 0x11b   : > { %v529_v23 = vadd.f32 %v752_v21, %v528_v22 }
 0x11d   : > { %576 = vst [vmem:[%s980_s26] sm:$0xff] %v529_v23 }
 0x122   : > { %v531_v24 = vpop.f32.mrf.mxu1 }
 0x123   : > { %v532_v25 = vadd.f32 %v752_v21, %v531_v24 }
 0x125   : > { %577 = vst [vmem:[%s980_s26 + $0x8] sm:$0xff] %v532_v25 }
 0x12a   : > { %v534_v26 = vpop.f32.mrf.mxu1 }
 0x12b   : > { %v535_v27 = vadd.f32 %v752_v21, %v534_v26 }
 0x12d   : > { %578 = vst [vmem:[%s980_s26 + $0x10] sm:$0xff] %v535_v27 }
 0x132   : > { %v537_v28 = vpop.f32.mrf.mxu1 }
 0x133   : > { %v538_v29 = vadd.f32 %v752_v21, %v537_v28 }
 0x135   : > { %579 = vst [vmem:[%s980_s26 + $0x18] sm:$0xff] %v538_v29 }
 0x13a   : > { %v540_v30 = vpop.f32.mrf.mxu1 }
 0x13b   : > { %v541_v31 = vadd.f32 %v752_v21, %v540_v30 }
 0x13d   : > { %580 = vst [vmem:[%s980_s26 + $0x20] sm:$0xff] %v541_v31 }
 0x148   : > { %v543_v32 = vpop.f32.mrf.mxu2 }
 0x149   : > { %v544_v33 = vadd.f32 %v752_v21, %v543_v32 }
 0x14b   : > { %581 = vst [vmem:[%s980_s26 + $0x28] sm:$0xff] %v544_v33 }
 0x150   : > { %v546_v34 = vpop.f32.mrf.mxu2 }
 0x151   : > { %v547_v35 = vadd.f32 %v752_v21, %v546_v34 }
 0x153   : > { %582 = vst [vmem:[%s980_s26 + $0x30] sm:$0xff] %v547_v35 }
 0x158   : > { %v549_v36 = vpop.f32.mrf.mxu2 }
 0x159   : > { %v550_v37 = vadd.f32 %v752_v21, %v549_v36 }
 0x15b   : > { %583 = vst [vmem:[%s980_s26 + $0x38] sm:$0xff] %v550_v37 }
 0x160   : > { %v552_v38 = vpop.f32.mrf.mxu2 }
 0x161   : > { %v553_v39 = vadd.f32 %v752_v21, %v552_v38 }
 0x163   : > { %584 = vst [vmem:[%s980_s26 + $0x40] sm:$0xff] %v553_v39 }
 0x168   : > { %v555_v40 = vpop.f32.mrf.mxu2 }
 0x169   : > { %v556_v41 = vadd.f32 %v752_v21, %v555_v40 }
 0x16b   : > { %585 = vst [vmem:[%s980_s26 + $0x48] sm:$0xff] %v556_v41 }
 0x170   : > { %v558_v42 = vpop.f32.mrf.mxu2 }
 0x171   : > { %v559_v43 = vadd.f32 %v752_v21, %v558_v42 }
 0x173   : > { %586 = vst [vmem:[%s980_s26 + $0x50] sm:$0xff] %v559_v43 }
 0x178   : > { %v561_v44 = vpop.f32.mrf.mxu2 }
 0x179   : > { %v562_v45 = vadd.f32 %v752_v21, %v561_v44 }
 0x17b   : > { %587 = vst [vmem:[%s980_s26 + $0x58] sm:$0xff] %v562_v45 }
 0x180   : > { %v564_v46 = vpop.f32.mrf.mxu3 }
 0x181   : > { %v565_v47 = vadd.f32 %v752_v21, %v564_v46 }
 0x183   : > { %588 = vst [vmem:[%s980_s26 + $0x60] sm:$0xff] %v565_v47 }
 0x188   : > { %v567_v48 = vpop.f32.mrf.mxu3 }
 0x189   : > { %v568_v49 = vadd.f32 %v752_v21, %v567_v48 }
 0x18b   : > { %589 = vst [vmem:[%s980_s26 + $0x68] sm:$0xff] %v568_v49 }
 0x190   : > { %v570_v50 = vpop.f32.mrf.mxu3 }
 0x191   : > { %v571_v51 = vadd.f32 %v752_v21, %v570_v50 }
 0x193   : > { %590 = vst [vmem:[%s980_s26 + $0x70] sm:$0xff] %v571_v51 }
 0x198   : > { %v573_v52 = vpop.f32.mrf.mxu3 }
 0x199   : > { %v574_v53 = vadd.f32 %v752_v21, %v573_v52 }
 0x19b   : > { %591 = vst [vmem:[%s980_s26 + $0x78] sm:$0xff] %v574_v53 }
 0x19c PF: > { %s15_s18 = sadd.s32 1, %s759_s18  }
 0x19d   : > { %p12_p4 = scmp.ge.s32.totalorder %s15_s18, 4  }
 0x19f   :  { %14 = sbr.rel (!%p12_p4) target bundleno = 1 (0x1), region = 70 }

</bundles_post_ra>
